<compile_context>
chip_gen: v7x
topology: tpu7x:2x2x1
jax: 0.10.0
libtpu: 0.0.40
codegen_flags: <defaults>
</compile_context>

<pallas_src>
import functools

import jax
import jax.numpy as jnp
from jax.experimental import pallas as pl
from jax.experimental.pallas import tpu as pltpu

CONFIG = {
    "seasonality": 4,
    "input_size": 4,
    "output_size": 6,
    "state_hsize": 32,
    "num_of_categories": 6,
    "add_nl_layer": True,
    "rnn_cell_type": "LSTM",   # TODO(synk): only LSTM cells implemented (matches config)
    "dilations": [[1, 2], [2, 4]],
    "level_variability_penalty": 80,
}


def _pad_to(n, m):
    return ((n + m - 1) // m) * m


# ----------------------------------------------------------------------------
# Kernel 1: Holt-Winters-style exponential smoothing recurrence (sequential).
#           Fully unrolled; level-variability accumulator kept in vregs.
# ----------------------------------------------------------------------------
def _es_kernel(S, train_ref, lev_sm_ref, seas_sm_ref, init_seas_ref,
               levs_ref, seas_ref, sqacc_ref):
    T = train_ref.shape[0]
    lev_sms = jax.nn.sigmoid(lev_sm_ref[...])       # (1, B)
    seas_sms = jax.nn.sigmoid(seas_sm_ref[...])     # (1, B)

    # initial seasonalities: exp(init_seas[:, i]) for i in [0, S) plus exp(init_seas[:, 0])
    seas_ref[0:S, :] = jnp.exp(init_seas_ref[...])
    seas_ref[S:S + 1, :] = jnp.exp(init_seas_ref[0:1, :])

    lev_prev = train_ref[0:1, :] / seas_ref[0:1, :]
    levs_ref[0:1, :] = lev_prev

    acc = jnp.zeros_like(lev_prev)
    ld_prev = jnp.zeros_like(lev_prev)
    # fully unrolled serial recurrence (T is small & static); all slices static.
    for i in range(1, T):
        tr_i = train_ref[i:i + 1, :]
        seas_i = seas_ref[i:i + 1, :]
        new_lev = lev_sms * (tr_i / seas_i) + (1.0 - lev_sms) * lev_prev
        levs_ref[i:i + 1, :] = new_lev
        seas_ref[S + i:S + i + 1, :] = (
            seas_sms * (tr_i / new_lev) + (1.0 - seas_sms) * seas_i)
        ld = jnp.log(new_lev / lev_prev)
        if i >= 2:                                   # static Python branch
            acc = acc + (ld - ld_prev) ** 2
        lev_prev, ld_prev = new_lev, ld
    sqacc_ref[...] = acc                             # (1, B): sum_i (ld_i - ld_{i-1})^2


def es_smoothing(train, lev_sm_raw, seas_sm_raw, init_seas_raw, seasonality):
    """train: (B, T); raw (pre-sigmoid / pre-exp) smoothing params."""
    B, T = train.shape
    S = seasonality
    vm = pl.BlockSpec(memory_space=pltpu.MemorySpace.VMEM)
    kernel = functools.partial(_es_kernel, S)
    # TODO(synk): at production batch sizes, block the batch (lane) axis with a grid
    # and dimension_semantics=("parallel",) so v7x's two TensorCores split it.
    levs, seas, sqacc = pl.pallas_call(
        kernel,
        out_shape=(
            jax.ShapeDtypeStruct((T, B), jnp.float32),
            jax.ShapeDtypeStruct((T + S, B), jnp.float32),
            jax.ShapeDtypeStruct((1, B), jnp.float32),
        ),
        in_specs=[vm, vm, vm, vm],
        out_specs=(vm, vm, vm),
    )(
        train.T.astype(jnp.float32),
        lev_sm_raw.reshape(1, B).astype(jnp.float32),
        seas_sm_raw.reshape(1, B).astype(jnp.float32),
        init_seas_raw.T.astype(jnp.float32),
    )
    return levs.T, seas.T, sqacc                     # (B,T), (B,T+S), (1,B)


# ----------------------------------------------------------------------------
# Kernel 2: fused ResidualDRNN (dilated LSTM stack) + nl_layer + scoring head.
# ----------------------------------------------------------------------------
def _make_series_kernel(N, Bp, H, group_dils, add_nl):
    L = sum(len(g) for g in group_dils)
    M = N * Bp

    def kernel(*refs):
        x_ref = refs[0]                               # (M, Dp) bf16
        w_refs = refs[1:1 + 3 * L]                    # per layer: wih, whh (bf16), b (f32)
        nlw_ref, nlb_ref, scw_ref, scb_ref = refs[1 + 3 * L:5 + 3 * L]
        out_ref = refs[5 + 3 * L]                     # (M, 128) f32, lane-dense
        bufA, bufB, gx_scr, res_scr = refs[6 + 3 * L:]

        def run_layer(in_bf16, wih_ref, whh_ref, b_ref, out_buf, d):
            # Hoisted input projection: one big MXU matmul for the whole sequence.
            gx_scr[...] = (
                jnp.dot(in_bf16, wih_ref[...],
                        preferred_element_type=jnp.float32) + b_ref[...])
            whh = whh_ref[...]                        # (H, 4H) bf16, held in vregs
            # Recurrent state from d steps back is carried in registers (rolling
            # lists over the fully-unrolled time loop) -> no per-step state loads.
            zero = jnp.zeros((Bp, H), jnp.float32)
            h_hist = [zero] * d                       # h[t-d], ..., h[t-1]
            c_hist = [zero] * d
            for t in range(N):
                row = t * Bp
                h_prev = h_hist[0]
                c_prev = c_hist[0]
                gates = (gx_scr[row:row + Bp, :]
                         + jnp.dot(h_prev.astype(jnp.bfloat16), whh,
                                   preferred_element_type=jnp.float32))
                # gate layout [i, f, o, g]: one sigmoid over 3H lanes, one tanh over H.
                sig = jax.nn.sigmoid(gates[:, 0:3 * H])
                g_g = jnp.tanh(gates[:, 3 * H:4 * H])
                c_new = sig[:, H:2 * H] * c_prev + sig[:, 0:H] * g_g
                h_new = sig[:, 2 * H:3 * H] * jnp.tanh(c_new)
                out_buf[row:row + Bp, :] = h_new       # only for next layer / head
                h_hist = h_hist[1:] + [h_new]
                c_hist = c_hist[1:] + [c_new]

        cur = None                                    # None -> layer input is x_ref
        dst, alt = bufA, bufB
        li = 0
        for g, dils in enumerate(group_dils):
            if g > 0:
                res_scr[...] = cur[...]               # group input = residual
            for d in dils:
                wih_ref, whh_ref, b_ref = w_refs[3 * li:3 * li + 3]
                if cur is None:
                    in_bf16 = x_ref[...]
                else:
                    in_bf16 = cur[...].astype(jnp.bfloat16)
                run_layer(in_bf16, wih_ref, whh_ref, b_ref, dst, d)
                cur = dst
                dst, alt = alt, dst
                li += 1
            if g > 0:
                cur[...] = cur[...] + res_scr[...]

        final = cur[...]                              # (M, H) f32
        if add_nl:
            final = jnp.tanh(
                jnp.dot(final, nlw_ref[...],
                        preferred_element_type=jnp.float32) + nlb_ref[...])
        # Lane-dense store: scoring weights are zero-padded to 128 output lanes.
        out_ref[...] = (
            jnp.dot(final, scw_ref[...],
                    preferred_element_type=jnp.float32) + scb_ref[...])

    return kernel


def series_forward(window_input, params, config):
    """window_input: (N, B, Din) -> (N, B, output_size). One fused pallas_call."""
    N, B, Din = window_input.shape
    H = config["state_hsize"]
    O = config["output_size"]
    Bp = _pad_to(B, 8)
    Dp = _pad_to(Din, 128)
    OP = 128                                          # lane-dense head output width
    group_dils = tuple(tuple(d) for d in config["dilations"])
    L = sum(len(g) for g in group_dils)
    M = N * Bp

    x = jnp.pad(window_input.astype(jnp.float32),
                ((0, 0), (0, Bp - B), (0, Dp - Din)))
    x = x.reshape(M, Dp).astype(jnp.bfloat16)

    def reorder(w):                                   # torch gate order i,f,g,o -> i,f,o,g
        return jnp.concatenate(
            [w[..., :2 * H], w[..., 3 * H:4 * H], w[..., 2 * H:3 * H]], axis=-1)

    weight_args = []
    flat_cells = [cell for grp in params["drnn"] for cell in grp]
    for li, (wih, whh, b) in enumerate(flat_cells):
        wih_r = reorder(wih)
        if li == 0:                                   # pad layer-0 input features to Dp
            wih_r = jnp.pad(wih_r, ((0, Dp - wih_r.shape[0]), (0, 0)))
        weight_args.append(wih_r.astype(jnp.bfloat16))
        weight_args.append(reorder(whh).astype(jnp.bfloat16))
        weight_args.append(reorder(b).reshape(1, 4 * H).astype(jnp.float32))

    scw = jnp.zeros((H, OP), jnp.float32).at[:, :O].set(params["sc_w"])
    scb = jnp.zeros((1, OP), jnp.float32).at[:, :O].set(params["sc_b"].reshape(1, O))
    head_args = [params["nl_w"].astype(jnp.float32),
                 params["nl_b"].reshape(1, H).astype(jnp.float32), scw, scb]

    vm = pl.BlockSpec(memory_space=pltpu.MemorySpace.VMEM)
    kernel = _make_series_kernel(N, Bp, H, group_dils, config["add_nl_layer"])
    # TODO(synk): at production N/B, tile (window, batch) with a BlockSpec grid +
    # dimension_semantics=("parallel",...) and set vmem_limit_bytes (v7x has 64 MiB).
    out = pl.pallas_call(
        kernel,
        out_shape=jax.ShapeDtypeStruct((M, OP), jnp.float32),
        in_specs=[vm] * (1 + 3 * L + 4),
        out_specs=vm,
        scratch_shapes=[
            pltpu.VMEM((M, H), jnp.float32),          # inter-layer h ping buffer
            pltpu.VMEM((M, H), jnp.float32),          # inter-layer h pong buffer
            pltpu.VMEM((M, 4 * H), jnp.float32),      # hoisted x @ Wih gate pre-acts
            pltpu.VMEM((M, H), jnp.float32),          # group residual snapshot
        ],
    )(x, *weight_args, *head_args)
    return out.reshape(N, Bp, OP)[:, :B, :O]


# ----------------------------------------------------------------------------
# Full ESRNN forward.
# ----------------------------------------------------------------------------
def esrnn_forward(params, config, train, val, test, info_cat, idxs, testing=False):
    S = config["seasonality"]
    O = config["output_size"]
    I = config["input_size"]

    lev_sm_raw = params["init_lev_sms"][idxs]
    seas_sm_raw = params["init_seas_sms"][idxs]
    init_seas_raw = params["init_seasonalities"][idxs]

    if testing:
        train = jnp.concatenate([train, val], axis=1)
    train = train.astype(jnp.float32)
    B, T = train.shape

    levs_stacked, seas_stacked, sqacc = es_smoothing(
        train, lev_sm_raw, seas_sm_raw, init_seas_raw, S)

    loss_mean_sq_log_diff_level = 0.0
    if config["level_variability_penalty"] > 0 and T > 2:
        # raw mean of squared log-level diffs (the torch module does not scale it)
        loss_mean_sq_log_diff_level = jnp.sum(sqacc) / ((T - 2) * B)

    if O > S:
        start = seas_stacked.shape[1] - S
        end = start + O - S
        seas_stacked = jnp.concatenate(
            [seas_stacked, seas_stacked[:, start:end]], axis=1)

    # Vectorized window construction (single gather instead of a Python loop).
    deseas = train / seas_stacked[:, :T]                                  # (B, T)
    Nw = T - I + 1
    widx = jnp.arange(Nw)[:, None] + jnp.arange(I)[None, :]               # (Nw, I)
    lev_at = levs_stacked[:, I - 1:]                                      # (B, Nw)
    win_in = deseas[:, widx] / lev_at[:, :, None]                         # (B, Nw, I)
    win_in = jnp.transpose(win_in, (1, 0, 2))                             # (Nw, B, I)
    cat = jnp.broadcast_to(info_cat.astype(jnp.float32)[None],
                           (Nw, B, info_cat.shape[1]))
    window_input = jnp.concatenate([win_in, cat], axis=-1)                # (Nw, B, I+C)

    No = T - O - (I - 1)
    oidx = I + jnp.arange(No)[:, None] + jnp.arange(O)[None, :]           # (No, O)
    win_out = deseas[:, oidx] / levs_stacked[:, I - 1:I - 1 + No][:, :, None]
    window_output = jnp.transpose(win_out, (1, 0, 2))                     # (No, B, O)

    # Single fused DRNN+head pass; the stack is causal over the window axis, so the
    # first Nw-O outputs equal series_forward(window_input[:-O]) from the torch code.
    # TODO(synk): torch train()/eval() dropout toggle is a no-op here (dropout = 0).
    scores = series_forward(window_input, params, config)                 # (Nw, B, O)
    network_pred = scores[:-O]
    network_act = window_output
    network_output_non_train = scores

    hold_out_output_reseas = network_output_non_train[-1] * seas_stacked[:, -O:]
    hold_out_output_renorm = hold_out_output_reseas * levs_stacked[:, -1][:, None]
    hold_out_pred = hold_out_output_renorm * (hold_out_output_renorm > 0).astype(jnp.float32)
    hold_out_act = test if testing else val
    hold_out_act_deseas = hold_out_act.astype(jnp.float32) / seas_stacked[:, -O:]
    hold_out_act_deseas_norm = hold_out_act_deseas / levs_stacked[:, -1][:, None]

    return (network_pred, network_act,
            (hold_out_pred, network_output_non_train),
            (hold_out_act, hold_out_act_deseas_norm),
            loss_mean_sq_log_diff_level)


# ----------------------------------------------------------------------------
# Deterministic parameter init (mirrors module __init__ shapes; torch gate order).
# ----------------------------------------------------------------------------
def init_params(key, config, num_series):
    H = config["state_hsize"]
    O = config["output_size"]
    p = {}
    p["init_lev_sms"] = jnp.full((num_series,), 0.5, jnp.float32)
    p["init_seas_sms"] = jnp.full((num_series,), 0.5, jnp.float32)
    p["init_seasonalities"] = jnp.full((num_series, config["seasonality"]),
                                       0.5, jnp.float32)

    def uni(k, shape, scale):
        return jax.random.uniform(k, shape, jnp.float32, -scale, scale)

    scale = 1.0 / float(H) ** 0.5
    drnn = []
    for g, dils in enumerate(config["dilations"]):
        group = []
        for li, _ in enumerate(dils):
            if g == 0 and li == 0:
                din = config["input_size"] + config["num_of_categories"]
            else:
                din = H
            key, k1, k2, k3, k4 = jax.random.split(key, 5)
            wih = uni(k1, (din, 4 * H), scale)      # stored (in, 4H): x @ wih; i,f,g,o
            whh = uni(k2, (H, 4 * H), scale)
            b = uni(k3, (4 * H,), scale) + uni(k4, (4 * H,), scale)  # b_ih + b_hh
            group.append((wih, whh, b))
        drnn.append(group)
    p["drnn"] = drnn

    key, k1, k2, k3, k4 = jax.random.split(key, 5)
    p["nl_w"] = uni(k1, (H, H), scale)
    p["nl_b"] = uni(k2, (H,), scale)
    p["sc_w"] = uni(k3, (H, O), scale)
    p["sc_b"] = uni(k4, (O,), scale)
    return p


if __name__ == "__main__":
    key = jax.random.PRNGKey(0)
    B, T, num_series = 2, 16, 4
    k1, k2, k3, kp = jax.random.split(key, 4)
    train = jax.random.uniform(k1, (B, T), jnp.float32, 1.0, 2.0)
    val = jax.random.uniform(k2, (B, CONFIG["output_size"]), jnp.float32, 1.0, 2.0)
    test = jax.random.uniform(k3, (B, CONFIG["output_size"]), jnp.float32, 1.0, 2.0)
    info_cat = jax.nn.one_hot(jnp.array([1, 3]), CONFIG["num_of_categories"],
                              dtype=jnp.float32)
    idxs = jnp.array([1, 3], dtype=jnp.int32)

    params = init_params(kp, CONFIG, num_series)
    outputs = esrnn_forward(params, CONFIG, train, val, test, info_cat, idxs,
                            testing=False)

    leaves = jax.tree_util.tree_leaves(outputs)
    for leaf in leaves:
        jax.block_until_ready(leaf)
    assert all(bool(jnp.all(jnp.isfinite(jnp.asarray(l)))) for l in leaves)
    print("KERNEL_OK")
</pallas_src>

<mosaic_0001>
module attributes {stable_mosaic.version = 11 : i64} {
  func.func @_es_kernel(%arg0: memref<16x2xf32, #tpu.memory_space<vmem>>, %arg1: memref<1x2xf32, #tpu.memory_space<vmem>>, %arg2: memref<1x2xf32, #tpu.memory_space<vmem>>, %arg3: memref<4x2xf32, #tpu.memory_space<vmem>>, %arg4: memref<16x2xf32, #tpu.memory_space<vmem>>, %arg5: memref<20x2xf32, #tpu.memory_space<vmem>>, %arg6: memref<1x2xf32, #tpu.memory_space<vmem>>) attributes {dimension_semantics = [], scalar_prefetch = 0 : i64, scratch_operands = 0 : i64, tpu.core_type = #tpu.core_type<tc>} {
    %c0 = arith.constant 0 : index
    %c0_0 = arith.constant 0 : index
    %0 = vector.load %arg1[%c0, %c0_0] : memref<1x2xf32, #tpu.memory_space<vmem>>, vector<1x2xf32>
    %1 = arith.negf %0 : vector<1x2xf32>
    %2 = math.exp %1 : vector<1x2xf32>
    %cst = arith.constant 1.000000e+00 : f32
    %3 = vector.broadcast %cst : f32 to vector<1x2xf32>
    %4 = arith.addf %3, %2 : vector<1x2xf32>
    %5 = arith.divf %3, %4 : vector<1x2xf32>
    %c0_1 = arith.constant 0 : index
    %c0_2 = arith.constant 0 : index
    %6 = vector.load %arg2[%c0_1, %c0_2] : memref<1x2xf32, #tpu.memory_space<vmem>>, vector<1x2xf32>
    %7 = arith.negf %6 : vector<1x2xf32>
    %8 = math.exp %7 : vector<1x2xf32>
    %cst_3 = arith.constant 1.000000e+00 : f32
    %9 = vector.broadcast %cst_3 : f32 to vector<1x2xf32>
    %10 = arith.addf %9, %8 : vector<1x2xf32>
    %11 = arith.divf %9, %10 : vector<1x2xf32>
    %c0_4 = arith.constant 0 : index
    %c0_5 = arith.constant 0 : index
    %12 = vector.load %arg3[%c0_4, %c0_5] : memref<4x2xf32, #tpu.memory_space<vmem>>, vector<4x2xf32>
    %13 = math.exp %12 : vector<4x2xf32>
    %c0_6 = arith.constant 0 : index
    %c0_7 = arith.constant 0 : index
    %14 = vector.load %arg5[%c0_6, %c0_7] : memref<20x2xf32, #tpu.memory_space<vmem>>, vector<4x2xf32>
    tpu.vector_store %arg5[%c0_6, %c0_7], %13 {strides = array<i32>} : memref<20x2xf32, #tpu.memory_space<vmem>>, vector<4x2xf32>,
    %c0_8 = arith.constant 0 : index
    %c0_9 = arith.constant 0 : index
    %15 = vector.load %arg3[%c0_8, %c0_9] : memref<4x2xf32, #tpu.memory_space<vmem>>, vector<1x2xf32>
    %16 = math.exp %15 : vector<1x2xf32>
    %c4 = arith.constant 4 : index
    %c0_10 = arith.constant 0 : index
    %17 = vector.load %arg5[%c4, %c0_10] : memref<20x2xf32, #tpu.memory_space<vmem>>, vector<1x2xf32>
    tpu.vector_store %arg5[%c4, %c0_10], %16 {strides = array<i32>} : memref<20x2xf32, #tpu.memory_space<vmem>>, vector<1x2xf32>,
    %c0_11 = arith.constant 0 : index
    %c0_12 = arith.constant 0 : index
    %18 = vector.load %arg0[%c0_11, %c0_12] : memref<16x2xf32, #tpu.memory_space<vmem>>, vector<1x2xf32>
    %c0_13 = arith.constant 0 : index
    %c0_14 = arith.constant 0 : index
    %19 = vector.load %arg5[%c0_13, %c0_14] : memref<20x2xf32, #tpu.memory_space<vmem>>, vector<1x2xf32>
    %20 = arith.divf %18, %19 : vector<1x2xf32>
    %c0_15 = arith.constant 0 : index
    %c0_16 = arith.constant 0 : index
    %21 = vector.load %arg4[%c0_15, %c0_16] : memref<16x2xf32, #tpu.memory_space<vmem>>, vector<1x2xf32>
    tpu.vector_store %arg4[%c0_15, %c0_16], %20 {strides = array<i32>} : memref<16x2xf32, #tpu.memory_space<vmem>>, vector<1x2xf32>,
    %cst_17 = arith.constant 0.000000e+00 : f32
    %22 = vector.broadcast %cst_17 : f32 to vector<1x2xf32>
    %c1 = arith.constant 1 : index
    %c0_18 = arith.constant 0 : index
    %23 = vector.load %arg0[%c1, %c0_18] : memref<16x2xf32, #tpu.memory_space<vmem>>, vector<1x2xf32>
    %c1_19 = arith.constant 1 : index
    %c0_20 = arith.constant 0 : index
    %24 = vector.load %arg5[%c1_19, %c0_20] : memref<20x2xf32, #tpu.memory_space<vmem>>, vector<1x2xf32>
    %25 = arith.divf %23, %24 : vector<1x2xf32>
    %26 = arith.mulf %5, %25 : vector<1x2xf32>
    %cst_21 = arith.constant 1.000000e+00 : f32
    %27 = vector.broadcast %cst_21 : f32 to vector<1x2xf32>
    %28 = arith.subf %27, %5 : vector<1x2xf32>
    %29 = arith.mulf %28, %20 : vector<1x2xf32>
    %30 = arith.addf %26, %29 : vector<1x2xf32>
    %c1_22 = arith.constant 1 : index
    %c0_23 = arith.constant 0 : index
    %31 = vector.load %arg4[%c1_22, %c0_23] : memref<16x2xf32, #tpu.memory_space<vmem>>, vector<1x2xf32>
    tpu.vector_store %arg4[%c1_22, %c0_23], %30 {strides = array<i32>} : memref<16x2xf32, #tpu.memory_space<vmem>>, vector<1x2xf32>,
    %32 = arith.divf %23, %30 : vector<1x2xf32>
    %33 = arith.mulf %11, %32 : vector<1x2xf32>
    %cst_24 = arith.constant 1.000000e+00 : f32
    %34 = vector.broadcast %cst_24 : f32 to vector<1x2xf32>
    %35 = arith.subf %34, %11 : vector<1x2xf32>
    %36 = arith.mulf %35, %24 : vector<1x2xf32>
    %37 = arith.addf %33, %36 : vector<1x2xf32>
    %c5 = arith.constant 5 : index
    %c0_25 = arith.constant 0 : index
    %38 = vector.load %arg5[%c5, %c0_25] : memref<20x2xf32, #tpu.memory_space<vmem>>, vector<1x2xf32>
    tpu.vector_store %arg5[%c5, %c0_25], %37 {strides = array<i32>} : memref<20x2xf32, #tpu.memory_space<vmem>>, vector<1x2xf32>,
    %39 = arith.divf %30, %20 : vector<1x2xf32>
    %40 = math.log %39 : vector<1x2xf32>
    %c2 = arith.constant 2 : index
    %c0_26 = arith.constant 0 : index
    %41 = vector.load %arg0[%c2, %c0_26] : memref<16x2xf32, #tpu.memory_space<vmem>>, vector<1x2xf32>
    %c2_27 = arith.constant 2 : index
    %c0_28 = arith.constant 0 : index
    %42 = vector.load %arg5[%c2_27, %c0_28] : memref<20x2xf32, #tpu.memory_space<vmem>>, vector<1x2xf32>
    %43 = arith.divf %41, %42 : vector<1x2xf32>
    %44 = arith.mulf %5, %43 : vector<1x2xf32>
    %cst_29 = arith.constant 1.000000e+00 : f32
    %45 = vector.broadcast %cst_29 : f32 to vector<1x2xf32>
    %46 = arith.subf %45, %5 : vector<1x2xf32>
    %47 = arith.mulf %46, %30 : vector<1x2xf32>
    %48 = arith.addf %44, %47 : vector<1x2xf32>
    %c2_30 = arith.constant 2 : index
    %c0_31 = arith.constant 0 : index
    %49 = vector.load %arg4[%c2_30, %c0_31] : memref<16x2xf32, #tpu.memory_space<vmem>>, vector<1x2xf32>
    tpu.vector_store %arg4[%c2_30, %c0_31], %48 {strides = array<i32>} : memref<16x2xf32, #tpu.memory_space<vmem>>, vector<1x2xf32>,
    %50 = arith.divf %41, %48 : vector<1x2xf32>
    %51 = arith.mulf %11, %50 : vector<1x2xf32>
    %cst_32 = arith.constant 1.000000e+00 : f32
    %52 = vector.broadcast %cst_32 : f32 to vector<1x2xf32>
    %53 = arith.subf %52, %11 : vector<1x2xf32>
    %54 = arith.mulf %53, %42 : vector<1x2xf32>
    %55 = arith.addf %51, %54 : vector<1x2xf32>
    %c6 = arith.constant 6 : index
    %c0_33 = arith.constant 0 : index
    %56 = vector.load %arg5[%c6, %c0_33] : memref<20x2xf32, #tpu.memory_space<vmem>>, vector<1x2xf32>
    tpu.vector_store %arg5[%c6, %c0_33], %55 {strides = array<i32>} : memref<20x2xf32, #tpu.memory_space<vmem>>, vector<1x2xf32>,
    %57 = arith.divf %48, %30 : vector<1x2xf32>
    %58 = math.log %57 : vector<1x2xf32>
    %59 = arith.subf %58, %40 : vector<1x2xf32>
    %60 = arith.mulf %59, %59 : vector<1x2xf32>
    %61 = arith.addf %22, %60 : vector<1x2xf32>
    %c3 = arith.constant 3 : index
    %c0_34 = arith.constant 0 : index
    %62 = vector.load %arg0[%c3, %c0_34] : memref<16x2xf32, #tpu.memory_space<vmem>>, vector<1x2xf32>
    %c3_35 = arith.constant 3 : index
    %c0_36 = arith.constant 0 : index
    %63 = vector.load %arg5[%c3_35, %c0_36] : memref<20x2xf32, #tpu.memory_space<vmem>>, vector<1x2xf32>
    %64 = arith.divf %62, %63 : vector<1x2xf32>
    %65 = arith.mulf %5, %64 : vector<1x2xf32>
    %cst_37 = arith.constant 1.000000e+00 : f32
    %66 = vector.broadcast %cst_37 : f32 to vector<1x2xf32>
    %67 = arith.subf %66, %5 : vector<1x2xf32>
    %68 = arith.mulf %67, %48 : vector<1x2xf32>
    %69 = arith.addf %65, %68 : vector<1x2xf32>
    %c3_38 = arith.constant 3 : index
    %c0_39 = arith.constant 0 : index
    %70 = vector.load %arg4[%c3_38, %c0_39] : memref<16x2xf32, #tpu.memory_space<vmem>>, vector<1x2xf32>
    tpu.vector_store %arg4[%c3_38, %c0_39], %69 {strides = array<i32>} : memref<16x2xf32, #tpu.memory_space<vmem>>, vector<1x2xf32>,
    %71 = arith.divf %62, %69 : vector<1x2xf32>
    %72 = arith.mulf %11, %71 : vector<1x2xf32>
    %cst_40 = arith.constant 1.000000e+00 : f32
    %73 = vector.broadcast %cst_40 : f32 to vector<1x2xf32>
    %74 = arith.subf %73, %11 : vector<1x2xf32>
    %75 = arith.mulf %74, %63 : vector<1x2xf32>
    %76 = arith.addf %72, %75 : vector<1x2xf32>
    %c7 = arith.constant 7 : index
    %c0_41 = arith.constant 0 : index
    %77 = vector.load %arg5[%c7, %c0_41] : memref<20x2xf32, #tpu.memory_space<vmem>>, vector<1x2xf32>
    tpu.vector_store %arg5[%c7, %c0_41], %76 {strides = array<i32>} : memref<20x2xf32, #tpu.memory_space<vmem>>, vector<1x2xf32>,
    %78 = arith.divf %69, %48 : vector<1x2xf32>
    %79 = math.log %78 : vector<1x2xf32>
    %80 = arith.subf %79, %58 : vector<1x2xf32>
    %81 = arith.mulf %80, %80 : vector<1x2xf32>
    %82 = arith.addf %61, %81 : vector<1x2xf32>
    %c4_42 = arith.constant 4 : index
    %c0_43 = arith.constant 0 : index
    %83 = vector.load %arg0[%c4_42, %c0_43] : memref<16x2xf32, #tpu.memory_space<vmem>>, vector<1x2xf32>
    %c4_44 = arith.constant 4 : index
    %c0_45 = arith.constant 0 : index
    %84 = vector.load %arg5[%c4_44, %c0_45] : memref<20x2xf32, #tpu.memory_space<vmem>>, vector<1x2xf32>
    %85 = arith.divf %83, %84 : vector<1x2xf32>
    %86 = arith.mulf %5, %85 : vector<1x2xf32>
    %cst_46 = arith.constant 1.000000e+00 : f32
    %87 = vector.broadcast %cst_46 : f32 to vector<1x2xf32>
    %88 = arith.subf %87, %5 : vector<1x2xf32>
    %89 = arith.mulf %88, %69 : vector<1x2xf32>
    %90 = arith.addf %86, %89 : vector<1x2xf32>
    %c4_47 = arith.constant 4 : index
    %c0_48 = arith.constant 0 : index
    %91 = vector.load %arg4[%c4_47, %c0_48] : memref<16x2xf32, #tpu.memory_space<vmem>>, vector<1x2xf32>
    tpu.vector_store %arg4[%c4_47, %c0_48], %90 {strides = array<i32>} : memref<16x2xf32, #tpu.memory_space<vmem>>, vector<1x2xf32>,
    %92 = arith.divf %83, %90 : vector<1x2xf32>
    %93 = arith.mulf %11, %92 : vector<1x2xf32>
    %cst_49 = arith.constant 1.000000e+00 : f32
    %94 = vector.broadcast %cst_49 : f32 to vector<1x2xf32>
    %95 = arith.subf %94, %11 : vector<1x2xf32>
    %96 = arith.mulf %95, %84 : vector<1x2xf32>
    %97 = arith.addf %93, %96 : vector<1x2xf32>
    %c8 = arith.constant 8 : index
    %c0_50 = arith.constant 0 : index
    %98 = vector.load %arg5[%c8, %c0_50] : memref<20x2xf32, #tpu.memory_space<vmem>>, vector<1x2xf32>
    tpu.vector_store %arg5[%c8, %c0_50], %97 {strides = array<i32>} : memref<20x2xf32, #tpu.memory_space<vmem>>, vector<1x2xf32>,
    %99 = arith.divf %90, %69 : vector<1x2xf32>
    %100 = math.log %99 : vector<1x2xf32>
    %101 = arith.subf %100, %79 : vector<1x2xf32>
    %102 = arith.mulf %101, %101 : vector<1x2xf32>
    %103 = arith.addf %82, %102 : vector<1x2xf32>
    %c5_51 = arith.constant 5 : index
    %c0_52 = arith.constant 0 : index
    %104 = vector.load %arg0[%c5_51, %c0_52] : memref<16x2xf32, #tpu.memory_space<vmem>>, vector<1x2xf32>
    %c5_53 = arith.constant 5 : index
    %c0_54 = arith.constant 0 : index
    %105 = vector.load %arg5[%c5_53, %c0_54] : memref<20x2xf32, #tpu.memory_space<vmem>>, vector<1x2xf32>
    %106 = arith.divf %104, %105 : vector<1x2xf32>
    %107 = arith.mulf %5, %106 : vector<1x2xf32>
    %cst_55 = arith.constant 1.000000e+00 : f32
    %108 = vector.broadcast %cst_55 : f32 to vector<1x2xf32>
    %109 = arith.subf %108, %5 : vector<1x2xf32>
    %110 = arith.mulf %109, %90 : vector<1x2xf32>
    %111 = arith.addf %107, %110 : vector<1x2xf32>
    %c5_56 = arith.constant 5 : index
    %c0_57 = arith.constant 0 : index
    %112 = vector.load %arg4[%c5_56, %c0_57] : memref<16x2xf32, #tpu.memory_space<vmem>>, vector<1x2xf32>
    tpu.vector_store %arg4[%c5_56, %c0_57], %111 {strides = array<i32>} : memref<16x2xf32, #tpu.memory_space<vmem>>, vector<1x2xf32>,
    %113 = arith.divf %104, %111 : vector<1x2xf32>
    %114 = arith.mulf %11, %113 : vector<1x2xf32>
    %cst_58 = arith.constant 1.000000e+00 : f32
    %115 = vector.broadcast %cst_58 : f32 to vector<1x2xf32>
    %116 = arith.subf %115, %11 : vector<1x2xf32>
    %117 = arith.mulf %116, %105 : vector<1x2xf32>
    %118 = arith.addf %114, %117 : vector<1x2xf32>
    %c9 = arith.constant 9 : index
    %c0_59 = arith.constant 0 : index
    %119 = vector.load %arg5[%c9, %c0_59] : memref<20x2xf32, #tpu.memory_space<vmem>>, vector<1x2xf32>
    tpu.vector_store %arg5[%c9, %c0_59], %118 {strides = array<i32>} : memref<20x2xf32, #tpu.memory_space<vmem>>, vector<1x2xf32>,
    %120 = arith.divf %111, %90 : vector<1x2xf32>
    %121 = math.log %120 : vector<1x2xf32>
    %122 = arith.subf %121, %100 : vector<1x2xf32>
    %123 = arith.mulf %122, %122 : vector<1x2xf32>
    %124 = arith.addf %103, %123 : vector<1x2xf32>
    %c6_60 = arith.constant 6 : index
    %c0_61 = arith.constant 0 : index
    %125 = vector.load %arg0[%c6_60, %c0_61] : memref<16x2xf32, #tpu.memory_space<vmem>>, vector<1x2xf32>
    %c6_62 = arith.constant 6 : index
    %c0_63 = arith.constant 0 : index
    %126 = vector.load %arg5[%c6_62, %c0_63] : memref<20x2xf32, #tpu.memory_space<vmem>>, vector<1x2xf32>
    %127 = arith.divf %125, %126 : vector<1x2xf32>
    %128 = arith.mulf %5, %127 : vector<1x2xf32>
    %cst_64 = arith.constant 1.000000e+00 : f32
    %129 = vector.broadcast %cst_64 : f32 to vector<1x2xf32>
    %130 = arith.subf %129, %5 : vector<1x2xf32>
    %131 = arith.mulf %130, %111 : vector<1x2xf32>
    %132 = arith.addf %128, %131 : vector<1x2xf32>
    %c6_65 = arith.constant 6 : index
    %c0_66 = arith.constant 0 : index
    %133 = vector.load %arg4[%c6_65, %c0_66] : memref<16x2xf32, #tpu.memory_space<vmem>>, vector<1x2xf32>
    tpu.vector_store %arg4[%c6_65, %c0_66], %132 {strides = array<i32>} : memref<16x2xf32, #tpu.memory_space<vmem>>, vector<1x2xf32>,
    %134 = arith.divf %125, %132 : vector<1x2xf32>
    %135 = arith.mulf %11, %134 : vector<1x2xf32>
    %cst_67 = arith.constant 1.000000e+00 : f32
    %136 = vector.broadcast %cst_67 : f32 to vector<1x2xf32>
    %137 = arith.subf %136, %11 : vector<1x2xf32>
    %138 = arith.mulf %137, %126 : vector<1x2xf32>
    %139 = arith.addf %135, %138 : vector<1x2xf32>
    %c10 = arith.constant 10 : index
    %c0_68 = arith.constant 0 : index
    %140 = vector.load %arg5[%c10, %c0_68] : memref<20x2xf32, #tpu.memory_space<vmem>>, vector<1x2xf32>
    tpu.vector_store %arg5[%c10, %c0_68], %139 {strides = array<i32>} : memref<20x2xf32, #tpu.memory_space<vmem>>, vector<1x2xf32>,
    %141 = arith.divf %132, %111 : vector<1x2xf32>
    %142 = math.log %141 : vector<1x2xf32>
    %143 = arith.subf %142, %121 : vector<1x2xf32>
    %144 = arith.mulf %143, %143 : vector<1x2xf32>
    %145 = arith.addf %124, %144 : vector<1x2xf32>
    %c7_69 = arith.constant 7 : index
    %c0_70 = arith.constant 0 : index
    %146 = vector.load %arg0[%c7_69, %c0_70] : memref<16x2xf32, #tpu.memory_space<vmem>>, vector<1x2xf32>
    %c7_71 = arith.constant 7 : index
    %c0_72 = arith.constant 0 : index
    %147 = vector.load %arg5[%c7_71, %c0_72] : memref<20x2xf32, #tpu.memory_space<vmem>>, vector<1x2xf32>
    %148 = arith.divf %146, %147 : vector<1x2xf32>
    %149 = arith.mulf %5, %148 : vector<1x2xf32>
    %cst_73 = arith.constant 1.000000e+00 : f32
    %150 = vector.broadcast %cst_73 : f32 to vector<1x2xf32>
    %151 = arith.subf %150, %5 : vector<1x2xf32>
    %152 = arith.mulf %151, %132 : vector<1x2xf32>
    %153 = arith.addf %149, %152 : vector<1x2xf32>
    %c7_74 = arith.constant 7 : index
    %c0_75 = arith.constant 0 : index
    %154 = vector.load %arg4[%c7_74, %c0_75] : memref<16x2xf32, #tpu.memory_space<vmem>>, vector<1x2xf32>
    tpu.vector_store %arg4[%c7_74, %c0_75], %153 {strides = array<i32>} : memref<16x2xf32, #tpu.memory_space<vmem>>, vector<1x2xf32>,
    %155 = arith.divf %146, %153 : vector<1x2xf32>
    %156 = arith.mulf %11, %155 : vector<1x2xf32>
    %cst_76 = arith.constant 1.000000e+00 : f32
    %157 = vector.broadcast %cst_76 : f32 to vector<1x2xf32>
    %158 = arith.subf %157, %11 : vector<1x2xf32>
    %159 = arith.mulf %158, %147 : vector<1x2xf32>
    %160 = arith.addf %156, %159 : vector<1x2xf32>
    %c11 = arith.constant 11 : index
    %c0_77 = arith.constant 0 : index
    %161 = vector.load %arg5[%c11, %c0_77] : memref<20x2xf32, #tpu.memory_space<vmem>>, vector<1x2xf32>
    tpu.vector_store %arg5[%c11, %c0_77], %160 {strides = array<i32>} : memref<20x2xf32, #tpu.memory_space<vmem>>, vector<1x2xf32>,
    %162 = arith.divf %153, %132 : vector<1x2xf32>
    %163 = math.log %162 : vector<1x2xf32>
    %164 = arith.subf %163, %142 : vector<1x2xf32>
    %165 = arith.mulf %164, %164 : vector<1x2xf32>
    %166 = arith.addf %145, %165 : vector<1x2xf32>
    %c8_78 = arith.constant 8 : index
    %c0_79 = arith.constant 0 : index
    %167 = vector.load %arg0[%c8_78, %c0_79] : memref<16x2xf32, #tpu.memory_space<vmem>>, vector<1x2xf32>
    %c8_80 = arith.constant 8 : index
    %c0_81 = arith.constant 0 : index
    %168 = vector.load %arg5[%c8_80, %c0_81] : memref<20x2xf32, #tpu.memory_space<vmem>>, vector<1x2xf32>
    %169 = arith.divf %167, %168 : vector<1x2xf32>
    %170 = arith.mulf %5, %169 : vector<1x2xf32>
    %cst_82 = arith.constant 1.000000e+00 : f32
    %171 = vector.broadcast %cst_82 : f32 to vector<1x2xf32>
    %172 = arith.subf %171, %5 : vector<1x2xf32>
    %173 = arith.mulf %172, %153 : vector<1x2xf32>
    %174 = arith.addf %170, %173 : vector<1x2xf32>
    %c8_83 = arith.constant 8 : index
    %c0_84 = arith.constant 0 : index
    %175 = vector.load %arg4[%c8_83, %c0_84] : memref<16x2xf32, #tpu.memory_space<vmem>>, vector<1x2xf32>
    tpu.vector_store %arg4[%c8_83, %c0_84], %174 {strides = array<i32>} : memref<16x2xf32, #tpu.memory_space<vmem>>, vector<1x2xf32>,
    %176 = arith.divf %167, %174 : vector<1x2xf32>
    %177 = arith.mulf %11, %176 : vector<1x2xf32>
    %cst_85 = arith.constant 1.000000e+00 : f32
    %178 = vector.broadcast %cst_85 : f32 to vector<1x2xf32>
    %179 = arith.subf %178, %11 : vector<1x2xf32>
    %180 = arith.mulf %179, %168 : vector<1x2xf32>
    %181 = arith.addf %177, %180 : vector<1x2xf32>
    %c12 = arith.constant 12 : index
    %c0_86 = arith.constant 0 : index
    %182 = vector.load %arg5[%c12, %c0_86] : memref<20x2xf32, #tpu.memory_space<vmem>>, vector<1x2xf32>
    tpu.vector_store %arg5[%c12, %c0_86], %181 {strides = array<i32>} : memref<20x2xf32, #tpu.memory_space<vmem>>, vector<1x2xf32>,
    %183 = arith.divf %174, %153 : vector<1x2xf32>
    %184 = math.log %183 : vector<1x2xf32>
    %185 = arith.subf %184, %163 : vector<1x2xf32>
    %186 = arith.mulf %185, %185 : vector<1x2xf32>
    %187 = arith.addf %166, %186 : vector<1x2xf32>
    %c9_87 = arith.constant 9 : index
    %c0_88 = arith.constant 0 : index
    %188 = vector.load %arg0[%c9_87, %c0_88] : memref<16x2xf32, #tpu.memory_space<vmem>>, vector<1x2xf32>
    %c9_89 = arith.constant 9 : index
    %c0_90 = arith.constant 0 : index
    %189 = vector.load %arg5[%c9_89, %c0_90] : memref<20x2xf32, #tpu.memory_space<vmem>>, vector<1x2xf32>
    %190 = arith.divf %188, %189 : vector<1x2xf32>
    %191 = arith.mulf %5, %190 : vector<1x2xf32>
    %cst_91 = arith.constant 1.000000e+00 : f32
    %192 = vector.broadcast %cst_91 : f32 to vector<1x2xf32>
    %193 = arith.subf %192, %5 : vector<1x2xf32>
    %194 = arith.mulf %193, %174 : vector<1x2xf32>
    %195 = arith.addf %191, %194 : vector<1x2xf32>
    %c9_92 = arith.constant 9 : index
    %c0_93 = arith.constant 0 : index
    %196 = vector.load %arg4[%c9_92, %c0_93] : memref<16x2xf32, #tpu.memory_space<vmem>>, vector<1x2xf32>
    tpu.vector_store %arg4[%c9_92, %c0_93], %195 {strides = array<i32>} : memref<16x2xf32, #tpu.memory_space<vmem>>, vector<1x2xf32>,
    %197 = arith.divf %188, %195 : vector<1x2xf32>
    %198 = arith.mulf %11, %197 : vector<1x2xf32>
    %cst_94 = arith.constant 1.000000e+00 : f32
    %199 = vector.broadcast %cst_94 : f32 to vector<1x2xf32>
    %200 = arith.subf %199, %11 : vector<1x2xf32>
    %201 = arith.mulf %200, %189 : vector<1x2xf32>
    %202 = arith.addf %198, %201 : vector<1x2xf32>
    %c13 = arith.constant 13 : index
    %c0_95 = arith.constant 0 : index
    %203 = vector.load %arg5[%c13, %c0_95] : memref<20x2xf32, #tpu.memory_space<vmem>>, vector<1x2xf32>
    tpu.vector_store %arg5[%c13, %c0_95], %202 {strides = array<i32>} : memref<20x2xf32, #tpu.memory_space<vmem>>, vector<1x2xf32>,
    %204 = arith.divf %195, %174 : vector<1x2xf32>
    %205 = math.log %204 : vector<1x2xf32>
    %206 = arith.subf %205, %184 : vector<1x2xf32>
    %207 = arith.mulf %206, %206 : vector<1x2xf32>
    %208 = arith.addf %187, %207 : vector<1x2xf32>
    %c10_96 = arith.constant 10 : index
    %c0_97 = arith.constant 0 : index
    %209 = vector.load %arg0[%c10_96, %c0_97] : memref<16x2xf32, #tpu.memory_space<vmem>>, vector<1x2xf32>
    %c10_98 = arith.constant 10 : index
    %c0_99 = arith.constant 0 : index
    %210 = vector.load %arg5[%c10_98, %c0_99] : memref<20x2xf32, #tpu.memory_space<vmem>>, vector<1x2xf32>
    %211 = arith.divf %209, %210 : vector<1x2xf32>
    %212 = arith.mulf %5, %211 : vector<1x2xf32>
    %cst_100 = arith.constant 1.000000e+00 : f32
    %213 = vector.broadcast %cst_100 : f32 to vector<1x2xf32>
    %214 = arith.subf %213, %5 : vector<1x2xf32>
    %215 = arith.mulf %214, %195 : vector<1x2xf32>
    %216 = arith.addf %212, %215 : vector<1x2xf32>
    %c10_101 = arith.constant 10 : index
    %c0_102 = arith.constant 0 : index
    %217 = vector.load %arg4[%c10_101, %c0_102] : memref<16x2xf32, #tpu.memory_space<vmem>>, vector<1x2xf32>
    tpu.vector_store %arg4[%c10_101, %c0_102], %216 {strides = array<i32>} : memref<16x2xf32, #tpu.memory_space<vmem>>, vector<1x2xf32>,
    %218 = arith.divf %209, %216 : vector<1x2xf32>
    %219 = arith.mulf %11, %218 : vector<1x2xf32>
    %cst_103 = arith.constant 1.000000e+00 : f32
    %220 = vector.broadcast %cst_103 : f32 to vector<1x2xf32>
    %221 = arith.subf %220, %11 : vector<1x2xf32>
    %222 = arith.mulf %221, %210 : vector<1x2xf32>
    %223 = arith.addf %219, %222 : vector<1x2xf32>
    %c14 = arith.constant 14 : index
    %c0_104 = arith.constant 0 : index
    %224 = vector.load %arg5[%c14, %c0_104] : memref<20x2xf32, #tpu.memory_space<vmem>>, vector<1x2xf32>
    tpu.vector_store %arg5[%c14, %c0_104], %223 {strides = array<i32>} : memref<20x2xf32, #tpu.memory_space<vmem>>, vector<1x2xf32>,
    %225 = arith.divf %216, %195 : vector<1x2xf32>
    %226 = math.log %225 : vector<1x2xf32>
    %227 = arith.subf %226, %205 : vector<1x2xf32>
    %228 = arith.mulf %227, %227 : vector<1x2xf32>
    %229 = arith.addf %208, %228 : vector<1x2xf32>
    %c11_105 = arith.constant 11 : index
    %c0_106 = arith.constant 0 : index
    %230 = vector.load %arg0[%c11_105, %c0_106] : memref<16x2xf32, #tpu.memory_space<vmem>>, vector<1x2xf32>
    %c11_107 = arith.constant 11 : index
    %c0_108 = arith.constant 0 : index
    %231 = vector.load %arg5[%c11_107, %c0_108] : memref<20x2xf32, #tpu.memory_space<vmem>>, vector<1x2xf32>
    %232 = arith.divf %230, %231 : vector<1x2xf32>
    %233 = arith.mulf %5, %232 : vector<1x2xf32>
    %cst_109 = arith.constant 1.000000e+00 : f32
    %234 = vector.broadcast %cst_109 : f32 to vector<1x2xf32>
    %235 = arith.subf %234, %5 : vector<1x2xf32>
    %236 = arith.mulf %235, %216 : vector<1x2xf32>
    %237 = arith.addf %233, %236 : vector<1x2xf32>
    %c11_110 = arith.constant 11 : index
    %c0_111 = arith.constant 0 : index
    %238 = vector.load %arg4[%c11_110, %c0_111] : memref<16x2xf32, #tpu.memory_space<vmem>>, vector<1x2xf32>
    tpu.vector_store %arg4[%c11_110, %c0_111], %237 {strides = array<i32>} : memref<16x2xf32, #tpu.memory_space<vmem>>, vector<1x2xf32>,
    %239 = arith.divf %230, %237 : vector<1x2xf32>
    %240 = arith.mulf %11, %239 : vector<1x2xf32>
    %cst_112 = arith.constant 1.000000e+00 : f32
    %241 = vector.broadcast %cst_112 : f32 to vector<1x2xf32>
    %242 = arith.subf %241, %11 : vector<1x2xf32>
    %243 = arith.mulf %242, %231 : vector<1x2xf32>
    %244 = arith.addf %240, %243 : vector<1x2xf32>
    %c15 = arith.constant 15 : index
    %c0_113 = arith.constant 0 : index
    %245 = vector.load %arg5[%c15, %c0_113] : memref<20x2xf32, #tpu.memory_space<vmem>>, vector<1x2xf32>
    tpu.vector_store %arg5[%c15, %c0_113], %244 {strides = array<i32>} : memref<20x2xf32, #tpu.memory_space<vmem>>, vector<1x2xf32>,
    %246 = arith.divf %237, %216 : vector<1x2xf32>
    %247 = math.log %246 : vector<1x2xf32>
    %248 = arith.subf %247, %226 : vector<1x2xf32>
    %249 = arith.mulf %248, %248 : vector<1x2xf32>
    %250 = arith.addf %229, %249 : vector<1x2xf32>
    %c12_114 = arith.constant 12 : index
    %c0_115 = arith.constant 0 : index
    %251 = vector.load %arg0[%c12_114, %c0_115] : memref<16x2xf32, #tpu.memory_space<vmem>>, vector<1x2xf32>
    %c12_116 = arith.constant 12 : index
    %c0_117 = arith.constant 0 : index
    %252 = vector.load %arg5[%c12_116, %c0_117] : memref<20x2xf32, #tpu.memory_space<vmem>>, vector<1x2xf32>
    %253 = arith.divf %251, %252 : vector<1x2xf32>
    %254 = arith.mulf %5, %253 : vector<1x2xf32>
    %cst_118 = arith.constant 1.000000e+00 : f32
    %255 = vector.broadcast %cst_118 : f32 to vector<1x2xf32>
    %256 = arith.subf %255, %5 : vector<1x2xf32>
    %257 = arith.mulf %256, %237 : vector<1x2xf32>
    %258 = arith.addf %254, %257 : vector<1x2xf32>
    %c12_119 = arith.constant 12 : index
    %c0_120 = arith.constant 0 : index
    %259 = vector.load %arg4[%c12_119, %c0_120] : memref<16x2xf32, #tpu.memory_space<vmem>>, vector<1x2xf32>
    tpu.vector_store %arg4[%c12_119, %c0_120], %258 {strides = array<i32>} : memref<16x2xf32, #tpu.memory_space<vmem>>, vector<1x2xf32>,
    %260 = arith.divf %251, %258 : vector<1x2xf32>
    %261 = arith.mulf %11, %260 : vector<1x2xf32>
    %cst_121 = arith.constant 1.000000e+00 : f32
    %262 = vector.broadcast %cst_121 : f32 to vector<1x2xf32>
    %263 = arith.subf %262, %11 : vector<1x2xf32>
    %264 = arith.mulf %263, %252 : vector<1x2xf32>
    %265 = arith.addf %261, %264 : vector<1x2xf32>
    %c16 = arith.constant 16 : index
    %c0_122 = arith.constant 0 : index
    %266 = vector.load %arg5[%c16, %c0_122] : memref<20x2xf32, #tpu.memory_space<vmem>>, vector<1x2xf32>
    tpu.vector_store %arg5[%c16, %c0_122], %265 {strides = array<i32>} : memref<20x2xf32, #tpu.memory_space<vmem>>, vector<1x2xf32>,
    %267 = arith.divf %258, %237 : vector<1x2xf32>
    %268 = math.log %267 : vector<1x2xf32>
    %269 = arith.subf %268, %247 : vector<1x2xf32>
    %270 = arith.mulf %269, %269 : vector<1x2xf32>
    %271 = arith.addf %250, %270 : vector<1x2xf32>
    %c13_123 = arith.constant 13 : index
    %c0_124 = arith.constant 0 : index
    %272 = vector.load %arg0[%c13_123, %c0_124] : memref<16x2xf32, #tpu.memory_space<vmem>>, vector<1x2xf32>
    %c13_125 = arith.constant 13 : index
    %c0_126 = arith.constant 0 : index
    %273 = vector.load %arg5[%c13_125, %c0_126] : memref<20x2xf32, #tpu.memory_space<vmem>>, vector<1x2xf32>
    %274 = arith.divf %272, %273 : vector<1x2xf32>
    %275 = arith.mulf %5, %274 : vector<1x2xf32>
    %cst_127 = arith.constant 1.000000e+00 : f32
    %276 = vector.broadcast %cst_127 : f32 to vector<1x2xf32>
    %277 = arith.subf %276, %5 : vector<1x2xf32>
    %278 = arith.mulf %277, %258 : vector<1x2xf32>
    %279 = arith.addf %275, %278 : vector<1x2xf32>
    %c13_128 = arith.constant 13 : index
    %c0_129 = arith.constant 0 : index
    %280 = vector.load %arg4[%c13_128, %c0_129] : memref<16x2xf32, #tpu.memory_space<vmem>>, vector<1x2xf32>
    tpu.vector_store %arg4[%c13_128, %c0_129], %279 {strides = array<i32>} : memref<16x2xf32, #tpu.memory_space<vmem>>, vector<1x2xf32>,
    %281 = arith.divf %272, %279 : vector<1x2xf32>
    %282 = arith.mulf %11, %281 : vector<1x2xf32>
    %cst_130 = arith.constant 1.000000e+00 : f32
    %283 = vector.broadcast %cst_130 : f32 to vector<1x2xf32>
    %284 = arith.subf %283, %11 : vector<1x2xf32>
    %285 = arith.mulf %284, %273 : vector<1x2xf32>
    %286 = arith.addf %282, %285 : vector<1x2xf32>
    %c17 = arith.constant 17 : index
    %c0_131 = arith.constant 0 : index
    %287 = vector.load %arg5[%c17, %c0_131] : memref<20x2xf32, #tpu.memory_space<vmem>>, vector<1x2xf32>
    tpu.vector_store %arg5[%c17, %c0_131], %286 {strides = array<i32>} : memref<20x2xf32, #tpu.memory_space<vmem>>, vector<1x2xf32>,
    %288 = arith.divf %279, %258 : vector<1x2xf32>
    %289 = math.log %288 : vector<1x2xf32>
    %290 = arith.subf %289, %268 : vector<1x2xf32>
    %291 = arith.mulf %290, %290 : vector<1x2xf32>
    %292 = arith.addf %271, %291 : vector<1x2xf32>
    %c14_132 = arith.constant 14 : index
    %c0_133 = arith.constant 0 : index
    %293 = vector.load %arg0[%c14_132, %c0_133] : memref<16x2xf32, #tpu.memory_space<vmem>>, vector<1x2xf32>
    %c14_134 = arith.constant 14 : index
    %c0_135 = arith.constant 0 : index
    %294 = vector.load %arg5[%c14_134, %c0_135] : memref<20x2xf32, #tpu.memory_space<vmem>>, vector<1x2xf32>
    %295 = arith.divf %293, %294 : vector<1x2xf32>
    %296 = arith.mulf %5, %295 : vector<1x2xf32>
    %cst_136 = arith.constant 1.000000e+00 : f32
    %297 = vector.broadcast %cst_136 : f32 to vector<1x2xf32>
    %298 = arith.subf %297, %5 : vector<1x2xf32>
    %299 = arith.mulf %298, %279 : vector<1x2xf32>
    %300 = arith.addf %296, %299 : vector<1x2xf32>
    %c14_137 = arith.constant 14 : index
    %c0_138 = arith.constant 0 : index
    %301 = vector.load %arg4[%c14_137, %c0_138] : memref<16x2xf32, #tpu.memory_space<vmem>>, vector<1x2xf32>
    tpu.vector_store %arg4[%c14_137, %c0_138], %300 {strides = array<i32>} : memref<16x2xf32, #tpu.memory_space<vmem>>, vector<1x2xf32>,
    %302 = arith.divf %293, %300 : vector<1x2xf32>
    %303 = arith.mulf %11, %302 : vector<1x2xf32>
    %cst_139 = arith.constant 1.000000e+00 : f32
    %304 = vector.broadcast %cst_139 : f32 to vector<1x2xf32>
    %305 = arith.subf %304, %11 : vector<1x2xf32>
    %306 = arith.mulf %305, %294 : vector<1x2xf32>
    %307 = arith.addf %303, %306 : vector<1x2xf32>
    %c18 = arith.constant 18 : index
    %c0_140 = arith.constant 0 : index
    %308 = vector.load %arg5[%c18, %c0_140] : memref<20x2xf32, #tpu.memory_space<vmem>>, vector<1x2xf32>
    tpu.vector_store %arg5[%c18, %c0_140], %307 {strides = array<i32>} : memref<20x2xf32, #tpu.memory_space<vmem>>, vector<1x2xf32>,
    %309 = arith.divf %300, %279 : vector<1x2xf32>
    %310 = math.log %309 : vector<1x2xf32>
    %311 = arith.subf %310, %289 : vector<1x2xf32>
    %312 = arith.mulf %311, %311 : vector<1x2xf32>
    %313 = arith.addf %292, %312 : vector<1x2xf32>
    %c15_141 = arith.constant 15 : index
    %c0_142 = arith.constant 0 : index
    %314 = vector.load %arg0[%c15_141, %c0_142] : memref<16x2xf32, #tpu.memory_space<vmem>>, vector<1x2xf32>
    %c15_143 = arith.constant 15 : index
    %c0_144 = arith.constant 0 : index
    %315 = vector.load %arg5[%c15_143, %c0_144] : memref<20x2xf32, #tpu.memory_space<vmem>>, vector<1x2xf32>
    %316 = arith.divf %314, %315 : vector<1x2xf32>
    %317 = arith.mulf %5, %316 : vector<1x2xf32>
    %cst_145 = arith.constant 1.000000e+00 : f32
    %318 = vector.broadcast %cst_145 : f32 to vector<1x2xf32>
    %319 = arith.subf %318, %5 : vector<1x2xf32>
    %320 = arith.mulf %319, %300 : vector<1x2xf32>
    %321 = arith.addf %317, %320 : vector<1x2xf32>
    %c15_146 = arith.constant 15 : index
    %c0_147 = arith.constant 0 : index
    %322 = vector.load %arg4[%c15_146, %c0_147] : memref<16x2xf32, #tpu.memory_space<vmem>>, vector<1x2xf32>
    tpu.vector_store %arg4[%c15_146, %c0_147], %321 {strides = array<i32>} : memref<16x2xf32, #tpu.memory_space<vmem>>, vector<1x2xf32>,
    %323 = arith.divf %314, %321 : vector<1x2xf32>
    %324 = arith.mulf %11, %323 : vector<1x2xf32>
    %cst_148 = arith.constant 1.000000e+00 : f32
    %325 = vector.broadcast %cst_148 : f32 to vector<1x2xf32>
    %326 = arith.subf %325, %11 : vector<1x2xf32>
    %327 = arith.mulf %326, %315 : vector<1x2xf32>
    %328 = arith.addf %324, %327 : vector<1x2xf32>
    %c19 = arith.constant 19 : index
    %c0_149 = arith.constant 0 : index
    %329 = vector.load %arg5[%c19, %c0_149] : memref<20x2xf32, #tpu.memory_space<vmem>>, vector<1x2xf32>
    tpu.vector_store %arg5[%c19, %c0_149], %328 {strides = array<i32>} : memref<20x2xf32, #tpu.memory_space<vmem>>, vector<1x2xf32>,
    %330 = arith.divf %321, %300 : vector<1x2xf32>
    %331 = math.log %330 : vector<1x2xf32>
    %332 = arith.subf %331, %310 : vector<1x2xf32>
    %333 = arith.mulf %332, %332 : vector<1x2xf32>
    %334 = arith.addf %313, %333 : vector<1x2xf32>
    %c0_150 = arith.constant 0 : index
    %c0_151 = arith.constant 0 : index
    %335 = vector.load %arg6[%c0_150, %c0_151] : memref<1x2xf32, #tpu.memory_space<vmem>>, vector<1x2xf32>
    tpu.vector_store %arg6[%c0_150, %c0_151], %334 {strides = array<i32>} : memref<1x2xf32, #tpu.memory_space<vmem>>, vector<1x2xf32>,
    return
  }
}

</mosaic_0001>

<bundles_post_ra>
// kernel: tpu_custom_call.1
= control target key start
LH: loop header
LB: loop body
LE: loop exit
PB: predicated region body
PF: predicated region fallthrough
CT: control target
= control target key end

     0   :  { %s915_s0 = inlined_call_operand.vmem [shape: f32[16,2], index: 0, kind: input, shape index: {}]   ;;  %s916_s1 = inlined_call_operand.vmem [shape: f32[1,2], index: 1, kind: input, shape index: {}]   ;;  %s917_s2 = inlined_call_operand.vmem [shape: f32[1,2], index: 2, kind: input, shape index: {}]   ;;  %s918_s3 = inlined_call_operand.vmem [shape: f32[4,2], index: 3, kind: input, shape index: {}]   ;;  %s919_s4 = inlined_call_operand.vmem [shape: f32[16,2], index: 4, kind: output, shape index: {0}]   ;;  %s920_s5 = inlined_call_operand.vmem [shape: f32[20,2], index: 5, kind: output, shape index: {1}]   ;;  %s921_s6 = inlined_call_operand.hbm [shape: f32[1,2], index: 6, kind: output, shape index: {2}]  }
   0x1   :  { %v35_v0 = vld [vmem:[%s918_s3] sm:$0xf] }
   0x2   :  { %v40_v1 = vld [vmem:[%s918_s3] sm:$0x1]  ;;  %v36_v2 = vmul.f32 1.442695, %v35_v0 }
   0x3   :  { %v41_v3 = vmul.f32 1.442695, %v40_v1  ;;  %v21_v4 = vld [vmem:[%s916_s1] sm:$0x1] }
   0x4   :  { %v373_v5 = vmul.f32 -1.442695, %v21_v4  ;;  %376 = vpow2.f32 %v36_v2 }
   0x5   :  { %378 = vpow2.f32 %v41_v3 }
   0x6   :  { %380 = vpow2.f32 %v373_v5 }
   0x7   :  { %12 = vsyncpa [#allocation3], 0  ;;  %vm38_vm0 = vcmask 11264   ;;  %vm43_vm1 = vcmask 8192   ;;  %v28_v6 = vld [vmem:[%s917_s2] sm:$0x1] }
   0x8   :  { %v374_v10 = vmul.f32 -1.442695, %v28_v6  ;;  %v45_v19 = vld [vmem:[%s915_s0] sm:$0x1]  ;;  %v50_v21 = vld [vmem:[%s915_s0 + $0x1] sm:$0x1] }
   0x9   :  { %v70_v26 = vld [vmem:[%s915_s0 + $0x2] sm:$0x1]  ;;  %v90_v33 = vld [vmem:[%s915_s0 + $0x3] sm:$0x1]  ;;  %v110_v36 = vld [vmem:[%s915_s0 + $0x4] sm:$0x1] }
   0xa   :  { %s506_s22 = smov [#allocation2]  }
   0xb   :  { %s361_s23 = sshll.u32 %s506_s22, 4  ;;  %s362_s23 = int_to_ptr.vmem [resolvable:$true] %s361_s23 }
   0xc   :  { %s482_s24 = scalar_lea.vmem %s362_s23, 16  ;;  %p487_p1 = scmp.lt.s32.totalorder %s362_s23, %s362_s23 }
   0xd   :  { %p483_p0 = scmp.ne.s32.totalorder %s362_s23, %s482_s24 }
   0xe   :  { %v377_v7 = vpop.eup %376 }
   0xf   :  { %v379_v8 = vpop.eup %378  ;;  %39 = vst.msk [vmem:[%s920_s5] sm:$0xf] %vm38_vm0, %v377_v7 }
  0x10   :  { %v381_v9 = vpop.eup %380  ;;  %44 = vst.msk [vmem:[%s920_s5 + $0x4] sm:$0x1] %vm43_vm1, %v379_v8 }
  0x11   :  { %v25_v11 = vadd.f32 1.0, %v381_v9 }
  0x13   :  { %382 = vrcp.f32 %v25_v11 }
  0x14   :  { %384 = vpow2.f32 %v374_v10 }
  0x16   :  { %v46_v12 = vld [vmem:[%s920_s5] sm:$0x1]  ;;  %v51_v13 = vld [vmem:[%s920_s5 + $0x1] sm:$0x1]  ;;  %v570_v14 = vld [vmem:[%s920_s5 + $0x2] sm:$0x1] }
  0x17   :  { %386 = vrcp.f32 %v46_v12  ;;  %v576_v15 = vld [vmem:[%s920_s5 + $0x3] sm:$0x1]  ;;  %v581_v16 = vld [vmem:[%s920_s5 + $0x4] sm:$0x1] }
  0x18   :  { %388 = vrcp.f32 %v51_v13 }
  0x19   :  { %390 = vrcp.f32 %v570_v14 }
  0x1a   :  { %392 = vrcp.f32 %v576_v15 }
  0x1b   :  { %394 = vrcp.f32 %v581_v16 }
  0x1d   :  { %v584_v17 = vpop.eup %382 }
  0x1e   :  { %v385_v18 = vpop.eup %384  ;;  %v591_v20 = vsub.f32 1.0, %v584_v17 }
  0x1f   :  { %v32_v23 = vadd.f32 1.0, %v385_v18 }
  0x21   :  { %v387_v22 = vpop.eup %386 }
  0x22   :  { %v389_v24 = vpop.eup %388  ;;  %v48_v25 = vmul.f32 %v387_v22, %v45_v19 }
  0x23   :  { %v391_v27 = vpop.eup %390  ;;  %v53_v28 = vmul.f32 %v389_v24, %v50_v21 }
  0x24   :  { %49 = vst.msk [vmem:[%s919_s4] sm:$0x1] %vm43_vm1, %v48_v25  ;;  %v56_v29 = vmul.f32 %v591_v20, %v48_v25  ;;  %396 = vrcp.f32 %v48_v25  ;;  %v73_v31 = vmul.f32 %v391_v27, %v70_v26  ;;  %v393_v32 = vpop.eup %392  ;;  %v130_v27 = vld [vmem:[%s915_s0 + $0x5] sm:$0x1] }
  0x25   :  { %v54_v30 = vmul.f32 %v584_v17, %v53_v28  ;;  %398 = vrcp.f32 %v32_v23  ;;  %v395_v35 = vpop.eup %394  ;;  %v93_v39 = vmul.f32 %v393_v32, %v90_v33 }
  0x26   :  { %v74_v37 = vmul.f32 %v584_v17, %v73_v31  ;;  %v113_v41 = vmul.f32 %v395_v35, %v110_v36  ;;  %v150_v35 = vld [vmem:[%s915_s0 + $0x6] sm:$0x1] }
  0x27   :  { %v57_v34 = vadd.f32 %v56_v29, %v54_v30  ;;  %v94_v42 = vmul.f32 %v584_v17, %v93_v39 }
  0x28   :  { %v114_v48 = vmul.f32 %v584_v17, %v113_v41 }
  0x29   :  { %58 = vst.msk [vmem:[%s919_s4 + $0x1] sm:$0x1] %vm43_vm1, %v57_v34  ;;  %400 = vrcp.f32 %v57_v34  ;;  %v75_v38 = vmul.f32 %v57_v34, %v591_v20 }
  0x2b   :  { %v76_v40 = vadd.f32 %v75_v38, %v74_v37 }
  0x2d   :  { %77 = vst.msk [vmem:[%s919_s4 + $0x2] sm:$0x1] %vm43_vm1, %v76_v40  ;;  %402 = vrcp.f32 %v76_v40  ;;  %v95_v43 = vmul.f32 %v76_v40, %v591_v20 }
  0x2e   :  { %v397_v44 = vpop.eup %396 }
  0x2f   :  { %v623_v45 = vpop.eup %398  ;;  %v67_v46 = vmul.f32 %v397_v44, %v57_v34  ;;  %v96_v47 = vadd.f32 %v95_v43, %v94_v42 }
  0x30   :  { %v632_v50 = vsub.f32 1.0, %v623_v45 }
  0x31   :  { %97 = vst.msk [vmem:[%s919_s4 + $0x3] sm:$0x1] %vm43_vm1, %v96_v47  ;;  %v115_v49 = vmul.f32 %v96_v47, %v591_v20  ;;  %404 = vrcp.f32 %v96_v47 }
  0x32   :  { %406 = vlog2.f32 %v67_v46  ;;  %v63_v56 = vmul.f32 %v632_v50, %v51_v13  ;;  %v81_v62 = vmul.f32 %v570_v14, %v632_v50  ;;  %v101_v6 = vmul.f32 %v576_v15, %v632_v50  ;;  %v170_v46 = vld [vmem:[%s915_s0 + $0x7] sm:$0x1] }
  0x33   :  { %v401_v51 = vpop.eup %400  ;;  %v116_v52 = vadd.f32 %v115_v49, %v114_v48  ;;  %v121_v14 = vmul.f32 %v581_v16, %v632_v50 }
  0x34   :  { %v84_v53 = vmul.f32 %v401_v51, %v76_v40  ;;  %v60_v54 = vmul.f32 %v401_v51, %v50_v21  ;;  %v190_v51 = vld [vmem:[%s915_s0 + $0x8] sm:$0x1] }
  0x35   :  { %117 = vst.msk [vmem:[%s919_s4 + $0x4] sm:$0x1] %vm43_vm1, %v116_v52  ;;  %408 = vrcp.f32 %v116_v52  ;;  %v135_v37 = vmul.f32 %v116_v52, %v591_v20 }
  0x36   :  { %410 = vlog2.f32 %v84_v53  ;;  %v61_v55 = vmul.f32 %v623_v45, %v60_v54 }
  0x37   :  { %v403_v57 = vpop.eup %402 }
  0x38   :  { %v104_v58 = vmul.f32 %v403_v57, %v96_v47  ;;  %v64_v59 = vadd.f32 %v63_v56, %v61_v55  ;;  %v79_v60 = vmul.f32 %v403_v57, %v70_v26 }
  0x3a   :  { %412 = vlog2.f32 %v104_v58  ;;  %65 = vst.msk [vmem:[%s920_s5 + $0x5] sm:$0x1] %vm43_vm1, %v64_v59  ;;  %v80_v61 = vmul.f32 %v623_v45, %v79_v60 }
  0x3b   :  { %v405_v63 = vpop.eup %404 }
  0x3c   :  { %v82_v0 = vadd.f32 %v81_v62, %v80_v61  ;;  %v124_v1 = vmul.f32 %v405_v63, %v116_v52  ;;  %v99_v2 = vmul.f32 %v405_v63, %v90_v33  ;;  %v407_v3 = vpop.eup %406 }
  0x3d   :  { %v69_v9 = vmul.f32 0.6931472, %v407_v3 }
  0x3e   :  { %83 = vst.msk [vmem:[%s920_s5 + $0x6] sm:$0x1] %vm43_vm1, %v82_v0  ;;  %414 = vlog2.f32 %v124_v1  ;;  %v100_v5 = vmul.f32 %v623_v45, %v99_v2 }
  0x3f   :  { %v409_v4 = vpop.eup %408 }
  0x40   :  { %v411_v7 = vpop.eup %410  ;;  %v119_v8 = vmul.f32 %v409_v4, %v110_v36  ;;  %v102_v11 = vadd.f32 %v101_v6, %v100_v5 }
  0x41   :  { %v86_v10 = vmul.f32 0.6931472, %v411_v7  ;;  %v657_v12 = vld [vmem:[%s920_s5 + $0x5] sm:$0x1] }
  0x42   :  { %v120_v13 = vmul.f32 %v623_v45, %v119_v8  ;;  %416 = vrcp.f32 %v657_v12  ;;  %103 = vst.msk [vmem:[%s920_s5 + $0x7] sm:$0x1] %vm43_vm1, %v102_v11  ;;  %v141_v2 = vmul.f32 %v657_v12, %v632_v50 }
  0x43   :  { %v87_v18 = vsub.f32 %v86_v10, %v69_v9 }
  0x44   :  { %v413_v15 = vpop.eup %412  ;;  %v122_v19 = vadd.f32 %v121_v14, %v120_v13 }
  0x45   :  { %v106_v21 = vmul.f32 0.6931472, %v413_v15  ;;  %v670_v22 = vld [vmem:[%s920_s5 + $0x6] sm:$0x1]  ;;  %v88_v24 = vmul.f32 %v87_v18, %v87_v18 }
  0x46   :  { %123 = vst.msk [vmem:[%s920_s5 + $0x8] sm:$0x1] %vm43_vm1, %v122_v19  ;;  %418 = vrcp.f32 %v670_v22 }
  0x47   :  { %v107_v16 = vsub.f32 %v106_v21, %v86_v10  ;;  %v161_v10 = vmul.f32 %v670_v22, %v632_v50 }
  0x48   :  { %v415_v23 = vpop.eup %414 }
  0x49   :  { %v108_v25 = vmul.f32 %v107_v16, %v107_v16  ;;  %v126_v26 = vmul.f32 0.6931472, %v415_v23  ;;  %v683_v28 = vld [vmem:[%s920_s5 + $0x7] sm:$0x1] }
  0x4a   :  { %420 = vrcp.f32 %v683_v28  ;;  %v181_v19 = vmul.f32 %v683_v28, %v632_v50 }
  0x4b   :  { %v109_v29 = vadd.f32 %v108_v25, %v88_v24  ;;  %v127_v31 = vsub.f32 %v126_v26, %v106_v21 }
  0x4c   :  { %v417_v30 = vpop.eup %416 }
  0x4d   :  { %v133_v32 = vmul.f32 %v417_v30, %v130_v27  ;;  %v689_v33 = vld [vmem:[%s920_s5 + $0x8] sm:$0x1]  ;;  %v128_v34 = vmul.f32 %v127_v31, %v127_v31 }
  0x4e   :  { %422 = vrcp.f32 %v689_v33 }
  0x4f   :  { %v134_v36 = vmul.f32 %v584_v17, %v133_v32  ;;  %v129_v39 = vadd.f32 %v128_v34, %v109_v29  ;;  %v201_v29 = vmul.f32 %v689_v33, %v632_v50  ;;  %v210_v33 = vld [vmem:[%s915_s0 + $0x9] sm:$0x1] }
  0x50   :  { %v419_v38 = vpop.eup %418 }
  0x51   :  { %v136_v40 = vadd.f32 %v135_v37, %v134_v36  ;;  %v153_v41 = vmul.f32 %v419_v38, %v150_v35 }
  0x53   :  { %137 = vst.msk [vmem:[%s919_s4 + $0x5] sm:$0x1] %vm43_vm1, %v136_v40  ;;  %424 = vrcp.f32 %v136_v40  ;;  %v144_v42 = vmul.f32 %v409_v4, %v136_v40  ;;  %v154_v43 = vmul.f32 %v584_v17, %v153_v41  ;;  %v155_v44 = vmul.f32 %v136_v40, %v591_v20 }
  0x54   :  { %v421_v47 = vpop.eup %420 }
  0x55   :  { %426 = vlog2.f32 %v144_v42  ;;  %v156_v48 = vadd.f32 %v155_v44, %v154_v43  ;;  %v173_v49 = vmul.f32 %v421_v47, %v170_v46 }
  0x57   :  { %157 = vst.msk [vmem:[%s919_s4 + $0x6] sm:$0x1] %vm43_vm1, %v156_v48  ;;  %428 = vrcp.f32 %v156_v48  ;;  %v175_v52 = vmul.f32 %v156_v48, %v591_v20  ;;  %v174_v54 = vmul.f32 %v584_v17, %v173_v49 }
  0x58   :  { %v423_v53 = vpop.eup %422 }
  0x59   :  { %v193_v55 = vmul.f32 %v423_v53, %v190_v51  ;;  %v176_v56 = vadd.f32 %v175_v52, %v174_v54 }
  0x5b   :  { %v194_v57 = vmul.f32 %v584_v17, %v193_v55  ;;  %177 = vst.msk [vmem:[%s919_s4 + $0x7] sm:$0x1] %vm43_vm1, %v176_v56  ;;  %430 = vrcp.f32 %v176_v56  ;;  %v195_v58 = vmul.f32 %v176_v56, %v591_v20 }
  0x5d   :  { %v425_v59 = vpop.eup %424  ;;  %v196_v61 = vadd.f32 %v195_v58, %v194_v57 }
  0x5e   :  { %v164_v60 = vmul.f32 %v425_v59, %v156_v48  ;;  %v139_v62 = vmul.f32 %v425_v59, %v130_v27  ;;  %v250_v59 = vld [vmem:[%s915_s0 + $0xb] sm:$0x1] }
  0x5f   :  { %v427_v63 = vpop.eup %426  ;;  %197 = vst.msk [vmem:[%s919_s4 + $0x8] sm:$0x1] %vm43_vm1, %v196_v61  ;;  %v215_v49 = vmul.f32 %v196_v61, %v591_v20 }
  0x60   :  { %v146_v0 = vmul.f32 0.6931472, %v427_v63  ;;  %432 = vlog2.f32 %v164_v60  ;;  %v140_v1 = vmul.f32 %v623_v45, %v139_v62 }
  0x61   :  { %v429_v3 = vpop.eup %428  ;;  %434 = vrcp.f32 %v196_v61 }
  0x62   :  { %v147_v4 = vsub.f32 %v146_v0, %v126_v26  ;;  %v184_v5 = vmul.f32 %v429_v3, %v176_v56  ;;  %v142_v6 = vadd.f32 %v141_v2, %v140_v1  ;;  %v159_v7 = vmul.f32 %v429_v3, %v150_v35  ;;  %v270_v1 = vld [vmem:[%s915_s0 + $0xc] sm:$0x1] }
  0x64   :  { %v148_v8 = vmul.f32 %v147_v4, %v147_v4  ;;  %436 = vlog2.f32 %v184_v5  ;;  %143 = vst.msk [vmem:[%s920_s5 + $0x9] sm:$0x1] %vm43_vm1, %v142_v6  ;;  %v160_v9 = vmul.f32 %v623_v45, %v159_v7 }
  0x65   :  { %v431_v11 = vpop.eup %430 }
  0x66   :  { %v162_v12 = vadd.f32 %v161_v10, %v160_v9  ;;  %v149_v13 = vadd.f32 %v148_v8, %v129_v39  ;;  %v204_v14 = vmul.f32 %v431_v11, %v196_v61  ;;  %v179_v18 = vmul.f32 %v431_v11, %v170_v46  ;;  %v230_v46 = vld [vmem:[%s915_s0 + $0xa] sm:$0x1] }
  0x68   :  { %163 = vst.msk [vmem:[%s920_s5 + $0xa] sm:$0x1] %vm43_vm1, %v162_v12  ;;  %438 = vlog2.f32 %v204_v14  ;;  %v180_v15 = vmul.f32 %v623_v45, %v179_v18 }
  0x6a   :  { %v433_v21 = vpop.eup %432  ;;  %v182_v22 = vadd.f32 %v181_v19, %v180_v15 }
  0x6b   :  { %v435_v16 = vpop.eup %434  ;;  %v166_v23 = vmul.f32 0.6931472, %v433_v21  ;;  %v745_v24 = vld [vmem:[%s920_s5 + $0x9] sm:$0x1] }
  0x6c   :  { %v199_v25 = vmul.f32 %v435_v16, %v190_v51  ;;  %440 = vrcp.f32 %v745_v24  ;;  %183 = vst.msk [vmem:[%s920_s5 + $0xb] sm:$0x1] %vm43_vm1, %v182_v22 }
  0x6d   :  { %v167_v26 = vsub.f32 %v166_v23, %v146_v0 }
  0x6e   :  { %v437_v27 = vpop.eup %436  ;;  %v200_v28 = vmul.f32 %v623_v45, %v199_v25 }
  0x6f   :  { %v168_v30 = vmul.f32 %v167_v26, %v167_v26  ;;  %v186_v31 = vmul.f32 0.6931472, %v437_v27  ;;  %v758_v32 = vld [vmem:[%s920_s5 + $0xa] sm:$0x1] }
  0x70   :  { %v202_v34 = vadd.f32 %v201_v29, %v200_v28  ;;  %442 = vrcp.f32 %v758_v32 }
  0x71   :  { %v169_v35 = vadd.f32 %v168_v30, %v149_v13  ;;  %v187_v36 = vsub.f32 %v186_v31, %v166_v23  ;;  %v221_v13 = vmul.f32 %v745_v24, %v632_v50  ;;  %v241_v23 = vmul.f32 %v758_v32, %v632_v50 }
  0x72   :  { %203 = vst.msk [vmem:[%s920_s5 + $0xc] sm:$0x1] %vm43_vm1, %v202_v34  ;;  %v439_v37 = vpop.eup %438 }
  0x73   :  { %v188_v38 = vmul.f32 %v187_v36, %v187_v36  ;;  %v771_v39 = vld [vmem:[%s920_s5 + $0xb] sm:$0x1]  ;;  %v206_v40 = vmul.f32 0.6931472, %v439_v37 }
  0x74   :  { %444 = vrcp.f32 %v771_v39  ;;  %v261_v29 = vmul.f32 %v771_v39, %v632_v50 }
  0x75   :  { %v189_v41 = vadd.f32 %v188_v38, %v169_v35  ;;  %v207_v43 = vsub.f32 %v206_v40, %v186_v31 }
  0x76   :  { %v441_v42 = vpop.eup %440 }
  0x77   :  { %v213_v44 = vmul.f32 %v441_v42, %v210_v33  ;;  %v208_v47 = vmul.f32 %v207_v43, %v207_v43  ;;  %v290_v43 = vld [vmem:[%s915_s0 + $0xd] sm:$0x1] }
  0x79   :  { %v214_v48 = vmul.f32 %v584_v17, %v213_v44  ;;  %v782_v51 = vld [vmem:[%s920_s5 + $0xc] sm:$0x1]  ;;  %v209_v53 = vadd.f32 %v208_v47, %v189_v41 }
  0x7a   :  { %v443_v52 = vpop.eup %442  ;;  %446 = vrcp.f32 %v782_v51 }
  0x7b   :  { %v216_v54 = vadd.f32 %v215_v49, %v214_v48  ;;  %v233_v55 = vmul.f32 %v443_v52, %v230_v46  ;;  %v310_v48 = vld [vmem:[%s915_s0 + $0xe] sm:$0x1] }
  0x7d   :  { %217 = vst.msk [vmem:[%s919_s4 + $0x9] sm:$0x1] %vm43_vm1, %v216_v54  ;;  %448 = vrcp.f32 %v216_v54  ;;  %v224_v56 = vmul.f32 %v435_v16, %v216_v54  ;;  %v234_v57 = vmul.f32 %v584_v17, %v233_v55  ;;  %v235_v58 = vmul.f32 %v216_v54, %v591_v20 }
  0x7e   :  { %v445_v60 = vpop.eup %444 }
  0x7f   :  { %450 = vlog2.f32 %v224_v56  ;;  %v236_v61 = vadd.f32 %v235_v58, %v234_v57  ;;  %v253_v62 = vmul.f32 %v445_v60, %v250_v59 }
  0x81   :  { %237 = vst.msk [vmem:[%s919_s4 + $0xa] sm:$0x1] %vm43_vm1, %v236_v61  ;;  %452 = vrcp.f32 %v236_v61  ;;  %v255_v63 = vmul.f32 %v236_v61, %v591_v20  ;;  %v254_v0 = vmul.f32 %v584_v17, %v253_v62 }
  0x83   :  { %v256_v3 = vadd.f32 %v255_v63, %v254_v0 }
  0x84   :  { %v447_v2 = vpop.eup %446 }
  0x85   :  { %v273_v4 = vmul.f32 %v447_v2, %v270_v1  ;;  %257 = vst.msk [vmem:[%s919_s4 + $0xb] sm:$0x1] %vm43_vm1, %v256_v3  ;;  %454 = vrcp.f32 %v256_v3  ;;  %v275_v5 = vmul.f32 %v256_v3, %v591_v20 }
  0x87   :  { %v449_v6 = vpop.eup %448  ;;  %v274_v7 = vmul.f32 %v584_v17, %v273_v4 }
  0x88   :  { %v244_v8 = vmul.f32 %v449_v6, %v236_v61  ;;  %v219_v9 = vmul.f32 %v449_v6, %v210_v33  ;;  %v281_v33 = vmul.f32 %v782_v51, %v632_v50 }
  0x89   :  { %v451_v10 = vpop.eup %450  ;;  %v276_v11 = vadd.f32 %v275_v5, %v274_v7 }
  0x8a   :  { %456 = vlog2.f32 %v244_v8  ;;  %v220_v12 = vmul.f32 %v623_v45, %v219_v9  ;;  %v226_v14 = vmul.f32 0.6931472, %v451_v10 }
  0x8b   :  { %v453_v18 = vpop.eup %452  ;;  %277 = vst.msk [vmem:[%s919_s4 + $0xc] sm:$0x1] %vm43_vm1, %v276_v11  ;;  %458 = vrcp.f32 %v276_v11  ;;  %v295_v51 = vmul.f32 %v276_v11, %v591_v20 }
  0x8c   :  { %v222_v15 = vadd.f32 %v221_v13, %v220_v12  ;;  %v239_v19 = vmul.f32 %v453_v18, %v230_v46  ;;  %v227_v21 = vsub.f32 %v226_v14, %v206_v40 }
  0x8e   :  { %223 = vst.msk [vmem:[%s920_s5 + $0xd] sm:$0x1] %vm43_vm1, %v222_v15  ;;  %v240_v16 = vmul.f32 %v623_v45, %v239_v19  ;;  %v228_v22 = vmul.f32 %v227_v21, %v227_v21 }
  0x8f   :  { %v455_v24 = vpop.eup %454 }
  0x90   :  { %v242_v25 = vadd.f32 %v241_v23, %v240_v16  ;;  %v229_v26 = vadd.f32 %v228_v22, %v209_v53  ;;  %v259_v27 = vmul.f32 %v455_v24, %v250_v59  ;;  %v264_v53 = vmul.f32 %v453_v18, %v256_v3  ;;  %v330_v59 = vld [vmem:[%s915_s0 + $0xf] sm:$0x1] }
  0x91   :  { %v284_v56 = vmul.f32 %v455_v24, %v276_v11 }
  0x92   :  { %243 = vst.msk [vmem:[%s920_s5 + $0xe] sm:$0x1] %vm43_vm1, %v242_v25  ;;  %v260_v28 = vmul.f32 %v623_v45, %v259_v27 }
  0x94   :  { %v457_v30 = vpop.eup %456  ;;  %v262_v34 = vadd.f32 %v261_v29, %v260_v28 }
  0x95   :  { %v459_v31 = vpop.eup %458  ;;  %v291_v32 = vld [vmem:[%s920_s5 + $0xd] sm:$0x1]  ;;  %v833_v35 = vmul.f32 0.6931472, %v457_v30 }
  0x96   :  { %v279_v36 = vmul.f32 %v459_v31, %v270_v1  ;;  %460 = vrcp.f32 %v291_v32  ;;  %263 = vst.msk [vmem:[%s920_s5 + $0xf] sm:$0x1] %vm43_vm1, %v262_v34  ;;  %v301_v9 = vmul.f32 %v291_v32, %v632_v50 }
  0x97   :  { %v247_v37 = vsub.f32 %v833_v35, %v226_v14 }
  0x98   :  { %v280_v38 = vmul.f32 %v623_v45, %v279_v36 }
  0x99   :  { %v311_v39 = vld [vmem:[%s920_s5 + $0xe] sm:$0x1]  ;;  %v248_v40 = vmul.f32 %v247_v37, %v247_v37 }
  0x9a   :  { %v282_v41 = vadd.f32 %v281_v33, %v280_v38  ;;  %462 = vrcp.f32 %v311_v39  ;;  %v321_v15 = vmul.f32 %v311_v39, %v632_v50 }
  0x9b   :  { %v846_v42 = vadd.f32 %v248_v40, %v229_v26 }
  0x9c   :  { %283 = vst.msk [vmem:[%s920_s5 + $0x10] sm:$0x1] %vm43_vm1, %v282_v41 }
  0x9d   :  { %v331_v44 = vld [vmem:[%s920_s5 + $0xf] sm:$0x1] }
  0x9e   :  { %464 = vrcp.f32 %v331_v44  ;;  %v341_v26 = vmul.f32 %v331_v44, %v632_v50 }
  0xa0   :  { %v461_v46 = vpop.eup %460 }
  0xa1   :  { %v293_v47 = vmul.f32 %v461_v46, %v290_v43 }
  0xa3   :  { %v294_v49 = vmul.f32 %v584_v17, %v293_v47 }
  0xa4   :  { %v463_v52 = vpop.eup %462 }
  0xa5   :  { %v296_v54 = vadd.f32 %v295_v51, %v294_v49  ;;  %v313_v55 = vmul.f32 %v463_v52, %v310_v48 }
  0xa7   :  { %297 = vst.msk [vmem:[%s919_s4 + $0xd] sm:$0x1] %vm43_vm1, %v296_v54  ;;  %466 = vrcp.f32 %v296_v54  ;;  %v314_v57 = vmul.f32 %v584_v17, %v313_v55  ;;  %v315_v58 = vmul.f32 %v296_v54, %v591_v20  ;;  %v304_v60 = vmul.f32 %v459_v31, %v296_v54 }
  0xa8   :  { %468 = vlog2.f32 %v264_v53  ;;  %v465_v61 = vpop.eup %464 }
  0xa9   :  { %v316_v62 = vadd.f32 %v315_v58, %v314_v57  ;;  %v333_v63 = vmul.f32 %v465_v61, %v330_v59  ;;  %470 = vlog2.f32 %v284_v56 }
  0xab   :  { %317 = vst.msk [vmem:[%s919_s4 + $0xe] sm:$0x1] %vm43_vm1, %v316_v62  ;;  %472 = vrcp.f32 %v316_v62  ;;  %v335_v0 = vmul.f32 %v316_v62, %v591_v20  ;;  %v334_v1 = vmul.f32 %v584_v17, %v333_v63 }
  0xac   :  { %474 = vlog2.f32 %v304_v60 }
  0xad   :  { %v336_v2 = vadd.f32 %v335_v0, %v334_v1 }
  0xaf   :  { %337 = vst.msk [vmem:[%s919_s4 + $0xf] sm:$0x1] %vm43_vm1, %v336_v2  ;;  %476 = vrcp.f32 %v336_v2 }
  0xb1   :  { %v467_v3 = vpop.eup %466 }
  0xb2   :  { %v469_v4 = vpop.eup %468  ;;  %v299_v5 = vmul.f32 %v467_v3, %v290_v43  ;;  %v324_v6 = vmul.f32 %v467_v3, %v316_v62 }
  0xb3   :  { %v471_v7 = vpop.eup %470  ;;  %v266_v17 = vmul.f32 0.6931472, %v469_v4 }
  0xb4   :  { %v300_v8 = vmul.f32 %v623_v45, %v299_v5  ;;  %478 = vlog2.f32 %v324_v6  ;;  %v286_v14 = vmul.f32 0.6931472, %v471_v7 }
  0xb5   :  { %v473_v20 = vpop.eup %472  ;;  %v267_v19 = vsub.f32 %v266_v17, %v833_v35 }
  0xb6   :  { %v475_v10 = vpop.eup %474  ;;  %v344_v11 = vmul.f32 %v473_v20, %v336_v2  ;;  %v302_v12 = vadd.f32 %v301_v9, %v300_v8  ;;  %v319_v13 = vmul.f32 %v473_v20, %v310_v48  ;;  %v287_v24 = vsub.f32 %v286_v14, %v266_v17 }
  0xb7   :  { %v306_v21 = vmul.f32 0.6931472, %v475_v10  ;;  %v268_v27 = vmul.f32 %v267_v19, %v267_v19 }
  0xb8   :  { %303 = vst.msk [vmem:[%s920_s5 + $0x11] sm:$0x1] %vm43_vm1, %v302_v12  ;;  %v320_v18 = vmul.f32 %v623_v45, %v319_v13  ;;  %480 = vlog2.f32 %v344_v11  ;;  %v288_v31 = vmul.f32 %v287_v24, %v287_v24 }
  0xb9   :  { %v477_v16 = vpop.eup %476  ;;  %v307_v28 = vsub.f32 %v306_v21, %v286_v14  ;;  %v269_v32 = vadd.f32 %v268_v27, %v846_v42 }
  0xba   :  { %v322_v23 = vadd.f32 %v321_v15, %v320_v18  ;;  %v339_v22 = vmul.f32 %v477_v16, %v330_v59 }
  0xbb   :  { %v308_v35 = vmul.f32 %v307_v28, %v307_v28  ;;  %v289_v38 = vadd.f32 %v288_v31, %v269_v32 }
  0xbc   :  { %323 = vst.msk [vmem:[%s920_s5 + $0x12] sm:$0x1] %vm43_vm1, %v322_v23  ;;  %v340_v25 = vmul.f32 %v623_v45, %v339_v22 }
  0xbd   :  { %v309_v50 = vadd.f32 %v308_v35, %v289_v38 }
  0xbe   :  { %v479_v29 = vpop.eup %478  ;;  %v342_v30 = vadd.f32 %v341_v26, %v340_v25 }
  0xbf   :  { %v326_v34 = vmul.f32 0.6931472, %v479_v29 }
  0xc0   :  { %343 = vst.msk [vmem:[%s920_s5 + $0x13] sm:$0x1] %vm43_vm1, %v342_v30  ;;  %s486_s5 = scalar_lea.vmem %s362_s23, 32 }
  0xc1   :  { %v327_v36 = vsub.f32 %v326_v34, %v306_v21  ;;  %p488_p2 = scmp.lt.s32.totalorder %s486_s5, %s482_s24 }
  0xc2   :  { %v481_v37 = vpop.eup %480 }
  0xc3   :  { %v328_v45 = vmul.f32 %v327_v36, %v327_v36  ;;  %v346_v33 = vmul.f32 0.6931472, %v481_v37  ;;  %p489_p3 = por %p488_p2, %p487_p1 }
  0xc5   :  { %v347_v39 = vsub.f32 %v346_v33, %v326_v34  ;;  %v329_v40 = vadd.f32 %v328_v45, %v309_v50  ;;  %p490_p4 = pnand %p489_p3, %p483_p0 }
  0xc7   :  { %v348_v41 = vmul.f32 %v347_v39, %v347_v39 }
  0xc9   :  { %v349_v43 = vadd.f32 %v348_v41, %v329_v40 }
  0xcb   :  { %350 = vst.msk [vmem:[#allocation2] sm:$0x1] %vm43_vm1, %v349_v43 }
  0xcc   :  { %493 = shalt.err (!%p490_p4)
}
  0xcd   :  { %s494_s27 = scalar_lea.hbm %s921_s6, 16 }
  0xce   :  { %p495_p5 = scmp.ne.s32.totalorder %s921_s6, %s494_s27  ;;  %p498_p6 = scmp.lt.u32.totalorder %s494_s27, %s921_s6 }
  0xd0   :  { %p500_p7 = pnand %p498_p6, %p495_p5 }
  0xd2   :  { %503 = shalt.err (!%p500_p7)
}
  0xd3   :  { %364 = dma.vmem_to_hbm [thread:$0]  %s362_s23, 16, %s921_s6, [#allocation3]  }
  0xd4   :  { %504 = dma.done.wait [#allocation3], 16  }
  0xd5   :  { %505 = vsyncadd [#allocation3], 4294967280 }
  0xd6   :  { %372 = vsyncpa [#allocation3], 1 }

</bundles_post_ra>
